<compile_context>
chip_gen: v7x
topology: tpu7x:2x2x1
jax: 0.10.0
libtpu: 0.0.40
codegen_flags: <defaults>
</compile_context>

<pallas_src>
import functools

import jax
import jax.numpy as jnp
from jax.experimental import pallas as pl
from jax.experimental.pallas import tpu as pltpu


# Mirror of intel_extension_for_pytorch EltwiseType
ELTWISE_NOT_FUSED = 0
ELTWISE_RELU = 1
ELTWISE_SIGMOID = 2


def _round_up(x, m):
    return ((x + m - 1) // m) * m


@functools.lru_cache(maxsize=1)
def _vmem_capacity_bytes():
    try:
        return int(pltpu.get_tpu_info().vmem_capacity_bytes)
    except Exception:
        return 64 * 1024 * 1024  # conservative (v7x-sized) fallback


def _default_tiles(vmem_cap_bytes):
    # 128-MiB-VMEM chips (v5e/v6e): very large output tiles to cross the HBM
    # ridge (v6e needs ~1024x2048 for bf16).  64-MiB chips (v7x): 1024x1024
    # keeps the double-buffered footprint ~12 MiB, well under a 48 MiB budget.
    if vmem_cap_bytes >= 96 * 1024 * 1024:
        return 1024, 2048, 512
    return 1024, 1024, 512


def _fit_tiles(dim, tile, align):
    """Pick a tile <= `tile`, multiple of `align`, minimizing padding of `dim`."""
    tile = max(align, min(tile, _round_up(dim, align)))
    n = -(-dim // tile)                       # number of tiles
    tile = _round_up(-(-dim // n), align)     # balance so padding overhead is small
    return tile, n * tile


def _vmem_footprint(tm, tn, tk, x_dtype, w_dtype, out_dtype, b_dtype,
                    k_buffers, acc_in_out):
    xb = jnp.dtype(x_dtype).itemsize
    wb = jnp.dtype(w_dtype).itemsize
    ob = jnp.dtype(out_dtype).itemsize
    bb = jnp.dtype(b_dtype).itemsize
    return (k_buffers * tm * tk * xb          # x stream (pipeline-depth buffered)
            + k_buffers * tk * tn * wb        # W stream
            + 2 * tm * tn * ob                # output (double-buffered)
            + 2 * 8 * tn * bb                 # bias tile (sublane-padded)
            + (0 if acc_in_out else tm * tn * 4))   # f32 accumulator scratch


def _linear_eltwise_kernel(x_ref, wt_ref, b_ref, o_ref, *acc_scratch,
                           eltwise, compute_dtype):
    """Tiled matmul with f32 accumulation; bias + eltwise fused on the last K step.

    When the output dtype is f32, the VMEM-resident output block itself is the
    accumulator (no scratch); otherwise acc_scratch[0] is an f32 VMEM scratch.
    """
    acc_ref = acc_scratch[0] if acc_scratch else o_ref
    k = pl.program_id(2)

    @pl.when(k == 0)
    def _():
        acc_ref[...] = jnp.zeros_like(acc_ref)

    a = x_ref[...]
    w = wt_ref[...]
    if a.dtype != compute_dtype:
        a = a.astype(compute_dtype)
    if w.dtype != compute_dtype:
        w = w.astype(compute_dtype)
    acc_ref[...] += jnp.dot(a, w, preferred_element_type=jnp.float32)

    @pl.when(k == pl.num_programs(2) - 1)
    def _():
        y = acc_ref[...] + b_ref[...].astype(jnp.float32)
        if eltwise == ELTWISE_RELU:
            y = jnp.maximum(y, 0.0)
        elif eltwise == ELTWISE_SIGMOID:
            y = jax.nn.sigmoid(y)      # exp on the EUP -> off the VALU critical path
        # ELTWISE_NOT_FUSED: identity
        o_ref[...] = y.astype(o_ref.dtype)


def _linear_eltwise_2d_prepadded(x2, wt_p, b_p, *, eltwise, n_out, tm, tn, tk,
                                 out_dtype, compute_dtype):
    """x2: (M, K); wt_p: (K_pad, N_pad) pre-padded (K_pad%tk==0, N_pad%tn==0);
    b_p: (1, N_pad). Returns (M, n_out)."""
    M, K = x2.shape
    K_pad, N_pad = wt_p.shape
    assert K <= K_pad and K_pad % tk == 0 and N_pad % tn == 0
    assert b_p.shape == (1, N_pad)
    out_dtype = jnp.dtype(out_dtype)

    vmem_cap = _vmem_capacity_bytes()
    budget = int(vmem_cap * 0.75)             # keep pipelining headroom (v7x: 48 MiB)

    acc_in_out = (out_dtype == jnp.dtype(jnp.float32))
    k_steps = K_pad // tk
    k_buffers = 3 if k_steps >= 8 else 2      # deeper K pipeline hides DMA jitter

    tm, M_pad = _fit_tiles(M, tm, 8)
    while (tm > 8 and _vmem_footprint(tm, tn, tk, x2.dtype, wt_p.dtype, out_dtype,
                                      b_p.dtype, k_buffers, acc_in_out) > budget):
        tm, M_pad = _fit_tiles(M, max(8, tm // 2), 8)

    if M_pad != M or K_pad != K:
        x_p = jnp.pad(x2, ((0, M_pad - M), (0, K_pad - K)))
    else:
        x_p = x2

    footprint = _vmem_footprint(tm, tn, tk, x_p.dtype, wt_p.dtype, out_dtype,
                                b_p.dtype, k_buffers, acc_in_out)
    vmem_limit = int(min(budget, max(footprint * 1.3, 32 * 1024 * 1024)))

    grid = (M_pad // tm, N_pad // tn, K_pad // tk)

    if k_buffers > 2:
        x_spec = pl.BlockSpec((tm, tk), lambda i, j, k: (i, k),
                              pipeline_mode=pl.Buffered(k_buffers))
        w_spec = pl.BlockSpec((tk, tn), lambda i, j, k: (k, j),
                              pipeline_mode=pl.Buffered(k_buffers))
    else:
        x_spec = pl.BlockSpec((tm, tk), lambda i, j, k: (i, k))
        w_spec = pl.BlockSpec((tk, tn), lambda i, j, k: (k, j))

    xb = jnp.dtype(x_p.dtype).itemsize
    wb = jnp.dtype(wt_p.dtype).itemsize
    ob = out_dtype.itemsize
    bb = jnp.dtype(b_p.dtype).itemsize
    cost = pl.CostEstimate(
        flops=2 * M_pad * N_pad * K_pad,
        transcendentals=(M_pad * N_pad if eltwise == ELTWISE_SIGMOID else 0),
        bytes_accessed=int(M_pad * K_pad * xb + K_pad * N_pad * wb
                           + N_pad * bb + M_pad * N_pad * ob),
    )

    scratch_shapes = [] if acc_in_out else [pltpu.VMEM((tm, tn), jnp.float32)]

    out = pl.pallas_call(
        functools.partial(_linear_eltwise_kernel, eltwise=eltwise,
                          compute_dtype=jnp.dtype(compute_dtype)),
        out_shape=jax.ShapeDtypeStruct((M_pad, N_pad), out_dtype),
        grid_spec=pltpu.PrefetchScalarGridSpec(
            num_scalar_prefetch=0,
            grid=grid,
            in_specs=[
                x_spec,                                        # x tile (tm, tk)
                w_spec,                                        # W^T tile (tk, tn)
                pl.BlockSpec((1, tn), lambda i, j, k: (0, j)),  # bias tile
            ],
            out_specs=pl.BlockSpec((tm, tn), lambda i, j, k: (i, j)),
            scratch_shapes=scratch_shapes,
        ),
        compiler_params=pltpu.CompilerParams(
            dimension_semantics=("parallel", "parallel", "arbitrary"),
            vmem_limit_bytes=vmem_limit,
        ),
        cost_estimate=cost,
    )(x_p, wt_p, b_p)

    if M_pad != M or N_pad != n_out:
        out = out[:M, :n_out]
    return out


def _forward(x, wt_p, b_p, *, eltwise, n_out, tm, tn, tk, out_dtype, compute_dtype):
    lead = x.shape[:-1]
    K = x.shape[-1]
    x2 = x.reshape(-1, K)
    out = _linear_eltwise_2d_prepadded(
        x2, wt_p, b_p, eltwise=eltwise, n_out=n_out, tm=tm, tn=tn, tk=tk,
        out_dtype=out_dtype, compute_dtype=compute_dtype)
    return out.reshape(*lead, n_out)


def ipex_linear_eltwise(x, weight, bias, eltwise, *, tm=None, tn=None, tk=None,
                        weight_is_transposed=False, compute_dtype=None,
                        out_dtype=None):
    """Fused y = eltwise(x @ weight.T + bias).  Functional (convenience) API.

    weight is (out_features, in_features) (PyTorch layout) unless
    weight_is_transposed=True.  Per-call weight transpose / cast / pad happens
    here; for repeated calls prefer the IPEXLinearEltwise class, which hoists
    all weight-side work into __init__.  `eltwise` must be a static Python int.
    Defaults to exact compute in x's dtype; pass compute_dtype=jnp.bfloat16 for
    the fast MXU path.
    """
    cap = _vmem_capacity_bytes()
    dtm, dtn, dtk = _default_tiles(cap)
    tm = dtm if tm is None else tm
    tn = dtn if tn is None else tn
    tk = dtk if tk is None else tk

    lead = x.shape[:-1]
    K = x.shape[-1]
    wt = weight if weight_is_transposed else weight.T
    assert wt.shape[0] == K
    N = wt.shape[1]
    compute_dtype = jnp.dtype(compute_dtype) if compute_dtype is not None \
        else jnp.dtype(x.dtype)
    out_dtype = jnp.dtype(out_dtype) if out_dtype is not None else jnp.dtype(x.dtype)

    tn, N_pad = _fit_tiles(N, tn, 128)
    tk, K_pad = _fit_tiles(K, tk, 128)

    if jnp.dtype(wt.dtype) != compute_dtype:
        wt = wt.astype(compute_dtype)
    if (K_pad, N_pad) != (K, N):
        wt = jnp.pad(wt, ((0, K_pad - K), (0, N_pad - N)))
    b = bias.astype(jnp.float32)
    if N_pad != N:
        b = jnp.pad(b, (0, N_pad - N))
    b = b.reshape(1, N_pad)

    out = _linear_eltwise_2d_prepadded(
        x.reshape(-1, K), wt, b, eltwise=int(eltwise), n_out=N,
        tm=tm, tn=tn, tk=tk, out_dtype=out_dtype, compute_dtype=compute_dtype)
    return out.reshape(*lead, N)


class IPEXLinearEltwise:
    """Module-style wrapper mirroring IPEX's IPEXLinearEltwise.

    The weight is transposed to (in_features, out_features), cast to the compute
    dtype (bf16 by default: MXU-native, halves weight HBM traffic) and padded to
    the tile grid exactly ONCE at construction (analogue of IPEX's packed-weight
    ctx).  The per-call path is just the fused Pallas matmul + bias + eltwise.
    """

    def __init__(self, weight, bias, eltwise="relu", *,
                 compute_dtype=jnp.bfloat16, out_dtype=None,
                 tm=None, tn=None, tk=None):
        if eltwise == "relu":
            self.eltwise = ELTWISE_RELU
        else:
            assert eltwise == "sigmoid"
            self.eltwise = ELTWISE_SIGMOID

        weight = jnp.asarray(weight)
        bias = jnp.asarray(bias)
        N, K = weight.shape
        assert bias.shape == (N,)
        self.out_features = N
        self.compute_dtype = jnp.dtype(compute_dtype)
        self.out_dtype = jnp.dtype(out_dtype) if out_dtype is not None else None

        cap = _vmem_capacity_bytes()
        dtm, dtn, dtk = _default_tiles(cap)
        self.tm = dtm if tm is None else tm
        tn = dtn if tn is None else tn
        tk = dtk if tk is None else tk
        self.tn, N_pad = _fit_tiles(N, tn, 128)
        self.tk, K_pad = _fit_tiles(K, tk, 128)

        # Pre-transpose + cast + pad once (hoisted out of the per-call hot path).
        wt = weight.T.astype(self.compute_dtype)
        if (K_pad, N_pad) != (K, N):
            wt = jnp.pad(wt, ((0, K_pad - K), (0, N_pad - N)))
        self.wt_p = wt
        b = bias.astype(jnp.float32)
        if N_pad != N:
            b = jnp.pad(b, (0, N_pad - N))
        self.b_p = b.reshape(1, N_pad)

        self._fns = {}

    def _get_fn(self, out_dtype):
        if out_dtype not in self._fns:
            self._fns[out_dtype] = jax.jit(functools.partial(
                _forward, eltwise=self.eltwise, n_out=self.out_features,
                tm=self.tm, tn=self.tn, tk=self.tk,
                out_dtype=out_dtype, compute_dtype=self.compute_dtype))
        return self._fns[out_dtype]

    def __call__(self, x):
        out_dtype = self.out_dtype if self.out_dtype is not None else jnp.dtype(x.dtype)
        return self._get_fn(out_dtype)(x, self.wt_p, self.b_p)


if __name__ == "__main__":
    # Small shapes consistent with the module's forward: (batch, seq, hidden)
    batch, seq, in_features, out_features = 2, 8, 32, 32

    key = jax.random.PRNGKey(0)
    kx, kw, kb = jax.random.split(key, 3)
    x = jax.random.normal(kx, (batch, seq, in_features), dtype=jnp.float32)
    weight = jax.random.normal(kw, (out_features, in_features), dtype=jnp.float32) * 0.1
    bias = jax.random.normal(kb, (out_features,), dtype=jnp.float32) * 0.1

    # 1) ReLU via the module wrapper: weight pre-transposed/cast(bf16)/padded once,
    #    f32 accumulation, f32 output.  Loose tolerance due to bf16 MXU inputs.
    mod_relu = IPEXLinearEltwise(weight, bias, "relu")
    y_relu = jax.block_until_ready(mod_relu(x))
    ref_relu = jnp.maximum(jnp.einsum("bsk,nk->bsn", x, weight) + bias, 0.0)
    assert y_relu.shape == ref_relu.shape and y_relu.dtype == jnp.float32
    assert jnp.allclose(y_relu, ref_relu, atol=3e-2, rtol=3e-2)

    # 2) Sigmoid via the functional API, exact f32 compute path (default).
    y_sig = jax.block_until_ready(ipex_linear_eltwise(x, weight, bias, ELTWISE_SIGMOID))
    ref_sig = jax.nn.sigmoid(jnp.einsum("bsk,nk->bsn", x, weight) + bias)
    assert jnp.allclose(y_sig, ref_sig, atol=1e-5, rtol=1e-5)

    # 3) bf16 end-to-end (bf16 x / W tiles on the MXU, f32 accumulation, bf16 out).
    xb = x.astype(jnp.bfloat16)
    wb = weight.astype(jnp.bfloat16)
    y_bf16 = jax.block_until_ready(ipex_linear_eltwise(xb, wb, bias, ELTWISE_RELU))
    ref_bf16 = jnp.maximum(
        jnp.einsum("bsk,nk->bsn", xb.astype(jnp.float32), wb.astype(jnp.float32)) + bias,
        0.0,
    )
    assert y_bf16.dtype == jnp.bfloat16
    assert jnp.allclose(y_bf16.astype(jnp.float32), ref_bf16, atol=2e-2, rtol=2e-2)

    print("KERNEL_OK")
</pallas_src>

<mosaic_0001>
module attributes {stable_mosaic.version = 11 : i64} {
  func.func @_linear_eltwise_kernel(%arg0: i32, %arg1: i32, %arg2: i32, %arg3: memref<16x128xf32, #tpu.memory_space<vmem>>, %arg4: memref<128x128xbf16, #tpu.memory_space<vmem>>, %arg5: memref<1x128xf32, #tpu.memory_space<vmem>>, %arg6: memref<16x128xf32, #tpu.memory_space<vmem>>) attributes {dimension_semantics = [#tpu.dimension_semantics<parallel>, #tpu.dimension_semantics<parallel>, #tpu.dimension_semantics<arbitrary>], iteration_bounds = array<i64: 1, 1, 1>, scalar_prefetch = 0 : i64, scratch_operands = 0 : i64, tpu.core_type = #tpu.core_type<tc>, window_params = [{transform_indices = @transform_0, window_bounds = array<i64: 16, 128>}, {transform_indices = @transform_1, window_bounds = array<i64: 128, 128>}, {transform_indices = @transform_2, window_bounds = array<i64: 1, 128>}, {transform_indices = @transform_3, window_bounds = array<i64: 16, 128>}]} {
    %c0_i32 = arith.constant 0 : i32
    %0 = arith.cmpi eq, %arg2, %c0_i32 : i32
    %1 = arith.extui %0 : i1 to i32
    %c0_i32_0 = arith.constant 0 : i32
    %2 = arith.cmpi ne, %1, %c0_i32_0 : i32
    scf.if %2 {
      %cst_10 = arith.constant 0.000000e+00 : f32
      %13 = vector.broadcast %cst_10 : f32 to vector<16x128xf32>
      %c0_11 = arith.constant 0 : index
      %c0_12 = arith.constant 0 : index
      %14 = vector.load %arg6[%c0_11, %c0_12] : memref<16x128xf32, #tpu.memory_space<vmem>>, vector<16x128xf32>
      tpu.vector_store %arg6[%c0_11, %c0_12], %13 {strides = array<i32>} : memref<16x128xf32, #tpu.memory_space<vmem>>, vector<16x128xf32>,
    } else {
    }
    %c0 = arith.constant 0 : index
    %c0_1 = arith.constant 0 : index
    %3 = vector.load %arg3[%c0, %c0_1] : memref<16x128xf32, #tpu.memory_space<vmem>>, vector<16x128xf32>
    %c0_2 = arith.constant 0 : index
    %c0_3 = arith.constant 0 : index
    %4 = vector.load %arg4[%c0_2, %c0_3] : memref<128x128xbf16, #tpu.memory_space<vmem>>, vector<128x128xbf16>
    %5 = arith.truncf %3 : vector<16x128xf32> to vector<16x128xbf16>
    %c0_4 = arith.constant 0 : index
    %c0_5 = arith.constant 0 : index
    %6 = vector.load %arg6[%c0_4, %c0_5] : memref<16x128xf32, #tpu.memory_space<vmem>>, vector<16x128xf32>
    %cst = arith.constant dense<0.000000e+00> : vector<16x128xf32>
    %7 = tpu.matmul %5, %4, %cst {dimension_numbers = #tpu.dot_dimension_numbers<[1], [0], [0], [1], [0, 0, 1, 1], [], []>} : vector<16x128xbf16>, vector<128x128xbf16>, vector<16x128xf32> -> vector<16x128xf32>
    %8 = arith.addf %6, %7 : vector<16x128xf32>
    %c0_6 = arith.constant 0 : index
    %c0_7 = arith.constant 0 : index
    %9 = vector.load %arg6[%c0_6, %c0_7] : memref<16x128xf32, #tpu.memory_space<vmem>>, vector<16x128xf32>
    tpu.vector_store %arg6[%c0_6, %c0_7], %8 {strides = array<i32>} : memref<16x128xf32, #tpu.memory_space<vmem>>, vector<16x128xf32>,
    %c0_i32_8 = arith.constant 0 : i32
    %10 = arith.cmpi eq, %arg2, %c0_i32_8 : i32
    %11 = arith.extui %10 : i1 to i32
    %c0_i32_9 = arith.constant 0 : i32
    %12 = arith.cmpi ne, %11, %c0_i32_9 : i32
    scf.if %12 {
      %c0_10 = arith.constant 0 : index
      %c0_11 = arith.constant 0 : index
      %13 = vector.load %arg6[%c0_10, %c0_11] : memref<16x128xf32, #tpu.memory_space<vmem>>, vector<16x128xf32>
      %c0_12 = arith.constant 0 : index
      %c0_13 = arith.constant 0 : index
      %14 = vector.load %arg5[%c0_12, %c0_13] : memref<1x128xf32, #tpu.memory_space<vmem>>, vector<1x128xf32>
      %15 = vector.broadcast %14 : vector<1x128xf32> to vector<16x128xf32>
      %16 = arith.addf %13, %15 : vector<16x128xf32>
      %cst_14 = arith.constant 0.000000e+00 : f32
      %17 = vector.broadcast %cst_14 : f32 to vector<16x128xf32>
      %18 = arith.maximumf %16, %17 : vector<16x128xf32>
      %c0_15 = arith.constant 0 : index
      %c0_16 = arith.constant 0 : index
      %19 = vector.load %arg6[%c0_15, %c0_16] : memref<16x128xf32, #tpu.memory_space<vmem>>, vector<16x128xf32>
      tpu.vector_store %arg6[%c0_15, %c0_16], %18 {strides = array<i32>} : memref<16x128xf32, #tpu.memory_space<vmem>>, vector<16x128xf32>,
    } else {
    }
    return
  }
  func.func @transform_0(%arg0: i32, %arg1: i32, %arg2: i32) -> (i32, i32) {
    %c0_i32 = arith.constant 0 : i32
    return %arg0, %arg2 : i32, i32
  }
  func.func @transform_1(%arg0: i32, %arg1: i32, %arg2: i32) -> (i32, i32) {
    %c0_i32 = arith.constant 0 : i32
    return %arg2, %arg1 : i32, i32
  }
  func.func @transform_2(%arg0: i32, %arg1: i32, %arg2: i32) -> (i32, i32) {
    %c0_i32 = arith.constant 0 : i32
    %c0_i32_0 = arith.constant 0 : i32
    return %c0_i32, %arg1 : i32, i32
  }
  func.func @transform_3(%arg0: i32, %arg1: i32, %arg2: i32) -> (i32, i32) {
    %c0_i32 = arith.constant 0 : i32
    return %arg0, %arg1 : i32, i32
  }
}

</mosaic_0001>

<bundles_post_ra>
// kernel: _forward.1
= control target key start
LH: loop header
LB: loop body
LE: loop exit
PB: predicated region body
PF: predicated region fallthrough
CT: control target
= control target key end

     0   :  { %8 = vsyncpa [#allocation3], 0  ;;  %s247_s12 = smov [#allocation2]   ;;  %s299_s0 = inlined_call_operand.vmem [shape: f32[16,128], index: 0, kind: input, shape index: {}]   ;;  %s300_s1 = inlined_call_operand.hbm [shape: bf16[128,128], index: 1, kind: input, shape index: {}]   ;;  %s301_s2 = inlined_call_operand.vmem [shape: f32[1,128], index: 2, kind: input, shape index: {}]   ;;  %s302_s3 = inlined_call_operand.vmem [shape: f32[16,128], index: 3, kind: output, shape index: {}]  }
   0x1   :  { %s16_s13 = sshll.u32 %s247_s12, 4  ;;  %s223_s16 = scalar_lea.hbm %s300_s1, 1024  ;;  %s17_s13 = int_to_ptr.vmem [resolvable:$true] %s16_s13 }
   0x2   :  { %p224_p0 = scmp.ne.s32.totalorder %s300_s1, %s223_s16  ;;  %p227_p1 = scmp.lt.u32.totalorder %s223_s16, %s300_s1 }
   0x4   :  { %p229_p2 = pnand %p227_p1, %p224_p0 }
   0x6   :  { %232 = shalt.err (!%p229_p2)
}
   0x7   :  { %s233_s21 = scalar_lea.vmem %s17_s13, 1024  ;;  %p238_p4 = scmp.lt.s32.totalorder %s17_s13, %s17_s13 }
   0x8   :  { %p234_p3 = scmp.ne.s32.totalorder %s17_s13, %s233_s21  ;;  %p239_p5 = scmp.lt.s32.totalorder %s233_s21, %s233_s21 }
   0xa   :  { %p240_p6 = por %p239_p5, %p238_p4 }
   0xc   :  { %p241_p7 = pnand %p240_p6, %p234_p3 }
   0xe   :  { %244 = shalt.err (!%p241_p7)
}
   0xf   :  { %s248_s22 = smov 64   ;;  %s249_s23 = smov 4  }
  0x10   :  { %22 = dma.hbm_to_vmem [thread:$0]  %s300_s1, 1024, %s17_s13, [#allocation3], %s248_s22, %s248_s22, %s249_s23  }
  0x11   :  { %245 = dma.done.wait [#allocation3], 1024  }
  0x12   :  { %246 = vsyncadd [#allocation3], 4294966272  ;;  %v250_v0 = vmov 0.0   ;;  %vm251_vm0 = vmmov 0   ;;  %v215_v1 = vld [vmem:[#allocation2] sm:$0xff]   ;;  %v216_v2 = vld [vmem:[#allocation2 + $0x8] sm:$0xff]  }
  0x13   :  { %190 = vmatprep.subr.bf16.mxu0 %v250_v0  ;;  %206 = vmatprep.mubr.msk.bf16.mxu0 %vm251_vm0, %v250_v0  ;;  %v217_v3 = vld [vmem:[#allocation2 + $0x10] sm:$0xff]   ;;  %v218_v4 = vld [vmem:[#allocation2 + $0x18] sm:$0xff]   ;;  %v219_v5 = vld [vmem:[#allocation2 + $0x20] sm:$0xff]  }
  0x14   :  { %191 = vmatpush3.bf16.msra.mxu0 %v215_v1  ;;  %v220_v6 = vld [vmem:[#allocation2 + $0x28] sm:$0xff]   ;;  %v221_v7 = vld [vmem:[#allocation2 + $0x30] sm:$0xff]   ;;  %v222_v8 = vld [vmem:[#allocation2 + $0x38] sm:$0xff]  }
  0x15   :  { %192 = vmatprep.subr.bf16.mxu0 %v250_v0  ;;  %v35_v9 = vld [vmem:[%s299_s0] sm:$0xff]  ;;  %v36_v10 = vld [vmem:[%s299_s0 + $0x8] sm:$0xff] }
  0x16   :  { %v53_v11 = vpack.c.bf16 %v36_v10, %v35_v9  ;;  %v180_v13 = vld [vmem:[%s301_s2] ss:$0 sm:$0xff] }
  0x18   :  { %193 = vmatpush3.bf16.msra.mxu0 %v216_v2 }
  0x19   :  { %194 = vmatprep.subr.bf16.mxu0 %v250_v0 }
  0x1c   :  { %195 = vmatpush3.bf16.msra.mxu0 %v217_v3 }
  0x1d   :  { %196 = vmatprep.subr.bf16.mxu0 %v250_v0 }
  0x20   :  { %197 = vmatpush3.bf16.msra.mxu0 %v218_v4 }
  0x21   :  { %198 = vmatprep.subr.bf16.mxu0 %v250_v0 }
  0x24   :  { %199 = vmatpush3.bf16.msra.mxu0 %v219_v5 }
  0x25   :  { %200 = vmatprep.subr.bf16.mxu0 %v250_v0 }
  0x28   :  { %201 = vmatpush3.bf16.msra.mxu0 %v220_v6 }
  0x29   :  { %202 = vmatprep.subr.bf16.mxu0 %v250_v0 }
  0x2c   :  { %203 = vmatpush3.bf16.msra.mxu0 %v221_v7 }
  0x2d   :  { %204 = vmatprep.subr.bf16.mxu0 %v250_v0 }
  0x30   :  { %205 = vmatpush3.bf16.msra.mxu0 %v222_v8 }
  0x33   :  { %207 = vmatmul.mubr.bf16.vlgmr.msra.gmra.mrb[0].mxu0 %v53_v11 }
 0x106   :  { %v138_v12 = vpop.f32.mrb[0].mxu0 }
 0x107   :  { %v208_v14 = vpop.f32.mrb[1].mxu0  ;;  %v161_v16 = vadd.f32 %v180_v13, %v138_v12 }
 0x108   :  { %v141_v15 = vpop.f32.mrb[2].mxu0 }
 0x109   :  { %v209_v17 = vpop.f32.mrb[3].mxu0  ;;  %v163_v18 = vmax.f32 %v161_v16, 0.0  ;;  %v162_v19 = vadd.f32 %v180_v13, %v141_v15 }
 0x10b   :  { %165 = vst [vmem:[%s302_s3] sm:$0xff] %v163_v18  ;;  %v164_v20 = vmax.f32 %v162_v19, 0.0 }
 0x10d   :  { %166 = vst [vmem:[%s302_s3 + $0x8] sm:$0xff] %v164_v20 }
 0x10e   :  { %171 = vsyncpa [#allocation3], 1 }

</bundles_post_ra>
